<compile_context>
chip_gen: v7x
topology: tpu7x:2x2x1
jax: 0.10.0
libtpu: 0.0.40
codegen_flags: <defaults>
</compile_context>

<pallas_src>
import functools

import jax
import jax.numpy as jnp
from jax.experimental import pallas as pl
from jax.experimental.pallas import tpu as pltpu

EPS = 1e-5
LANE = 128


def _rup(x, m):
    return (x + m - 1) // m * m


def _vmem_limit_bytes():
    """Generation-aware scoped-VMEM budget (~48 MiB on v7x, ~100 MiB on v5e/v6e)."""
    try:
        cap = int(pltpu.get_tpu_info().vmem_capacity_bytes)
    except Exception:
        cap = 64 * 1024 * 1024
    return max(min(cap - 16 * 1024 * 1024, 100 * 1024 * 1024), 32 * 1024 * 1024)


def _pick_b_tile(N, H, W, Cpi, Cpm, Cpo, vmem_limit):
    """Images per grid step: grow the GEMM M / amortize per-step overhead while
    keeping the heaviest pass (Pass B) comfortably inside VMEM."""
    per_img = H * W * (4 * Cpi + 2 * Cpm + 2 * Cpo) * 2        # f32 in + bf16 h1/sc, 2 bufs
    per_img += (H + 2) * (W + 2) * max(Cpi, Cpm) * 2           # bf16 padded scratch
    per_img += 2 * H * W * max(Cpi, Cpm) * 2                   # tap-slice temporaries
    fixed = (9 * Cpi * Cpm + 9 * Cpm * Cpo + Cpi * Cpo) * 2 * 2  # bf16 weights, 2 bufs
    budget = int(vmem_limit * 0.6)
    bt = 1
    for cand in range(1, min(N, 16) + 1):
        if N % cand == 0 and fixed + cand * per_img <= budget:
            bt = cand
    return bt


# --------------------------- shared in-kernel helpers ---------------------------
def _zero_halo(pad_ref, H, W):
    """Zero the 1-pixel halo of the (BT, H+2, W+2, C) bf16 scratch.

    Done every grid step (thin strips, cheap) instead of only at program_id==0
    so the grid axis can be "parallel": each TensorCore owns its own scratch and
    may start at a nonzero program_id."""
    BT = pad_ref.shape[0]
    C = pad_ref.shape[-1]
    dt = pad_ref.dtype
    row = jnp.zeros((BT, 1, W + 2, C), dt)
    pad_ref[:, 0:1, :, :] = row
    pad_ref[:, H + 1:H + 2, :, :] = row
    col = jnp.zeros((BT, H + 2, 1, C), dt)
    pad_ref[:, :, 0:1, :] = col
    pad_ref[:, :, W + 1:W + 2, :] = col


def _conv3x3_acc(pad_ref, w_ref, BT, H, W):
    """3x3 / stride-1 conv as nine accumulating MXU GEMMs over shifted views.

    No (M, 9C) im2col patch is materialized: each tap reads its shifted
    (BT, H, W, C) bf16 view of the padded scratch and multiplies against the
    matching (C, Cout) weight slab; accumulation is f32."""
    C = pad_ref.shape[-1]
    acc = None
    for kh in range(3):
        for kw in range(3):
            t = kh * 3 + kw
            tap = pad_ref[:, kh:kh + H, kw:kw + W, :].reshape(BT * H * W, C)
            part = jnp.dot(tap, w_ref[t * C:(t + 1) * C, :],
                           preferred_element_type=jnp.float32)
            acc = part if acc is None else acc + part
    return acc                                               # (BT*H*W, Cout) f32


# --------------------------- Pass A: BN1 partial sums ---------------------------
def _bn_stats_kernel(x_ref, s_ref, q_ref):
    C = x_ref.shape[-1]
    xf = x_ref[...].astype(jnp.float32).reshape(-1, C)
    s_ref[0] = jnp.sum(xf, axis=0, keepdims=True)
    q_ref[0] = jnp.sum(xf * xf, axis=0, keepdims=True)


# ------------- Pass B: BN1+ReLU -> conv1 (+shortcut, +BN2 partials) -------------
def _conv1_kernel(x_ref, m1_ref, v1_ref, g1_ref, b1_ref, w1_ref, *rest,
                  BT, H, W, has_shortcut):
    if has_shortcut:
        ws_ref, h1_ref, s2_ref, q2_ref, sc_ref, pad_ref = rest
    else:
        h1_ref, s2_ref, q2_ref, pad_ref = rest

    Cin = x_ref.shape[-1]

    # BN1 (global batch stats finalized in the wrapper) + ReLU, in f32.
    x = x_ref[...].astype(jnp.float32).reshape(BT * H * W, Cin)
    scale = g1_ref[...] * jax.lax.rsqrt(v1_ref[...] + EPS)
    shift = b1_ref[...] - m1_ref[...] * scale
    a = jnp.maximum(x * scale + shift, 0.0)
    a_bf = a.astype(jnp.bfloat16)

    # bf16 padded scratch: thin halo strips zeroed, interior written in bf16.
    _zero_halo(pad_ref, H, W)
    pad_ref[:, 1:H + 1, 1:W + 1, :] = a_bf.reshape(BT, H, W, Cin)

    # conv1: nine accumulating MXU GEMMs (bf16 operands, f32 accumulation).
    acc = _conv3x3_acc(pad_ref, w1_ref, BT, H, W)             # (BT*H*W, Cmid) f32
    Cmid = acc.shape[-1]
    h1b = acc.astype(jnp.bfloat16)
    h1_ref[...] = h1b.reshape(BT, H, W, Cmid)

    # Per-step BN2 partial sums computed from the bf16-rounded h1 (exactly what
    # Pass C will normalize); reduced to mean/var in the wrapper.
    hq = h1b.astype(jnp.float32)
    s2_ref[0] = jnp.sum(hq, axis=0, keepdims=True)
    q2_ref[0] = jnp.sum(hq * hq, axis=0, keepdims=True)

    if has_shortcut:
        sc = jnp.dot(a_bf, ws_ref[...], preferred_element_type=jnp.float32)
        sc_ref[...] = sc.reshape(BT, H, W, sc.shape[-1]).astype(sc_ref.dtype)


# ------------------- Pass C: BN2+ReLU -> conv2 + residual add -------------------
def _conv2_kernel(h1_ref, m2_ref, v2_ref, g2_ref, b2_ref, w2_ref, sc_ref,
                  out_ref, pad_ref, *, BT, H, W):
    Cmid = h1_ref.shape[-1]

    h = h1_ref[...].astype(jnp.float32).reshape(BT * H * W, Cmid)
    scale = g2_ref[...] * jax.lax.rsqrt(v2_ref[...] + EPS)
    shift = b2_ref[...] - m2_ref[...] * scale
    a2 = jnp.maximum(h * scale + shift, 0.0)

    _zero_halo(pad_ref, H, W)
    pad_ref[:, 1:H + 1, 1:W + 1, :] = a2.reshape(BT, H, W, Cmid).astype(pad_ref.dtype)

    acc = _conv3x3_acc(pad_ref, w2_ref, BT, H, W)             # (BT*H*W, Cout) f32
    Cout = acc.shape[-1]
    out = acc + sc_ref[...].astype(jnp.float32).reshape(BT * H * W, Cout)  # f32 residual
    out_ref[...] = out.reshape(BT, H, W, Cout).astype(out_ref.dtype)


# ----------------------------------- wrapper -----------------------------------
def preact_block(x_nchw, params, *, stride=1):
    """params: g1,b1 (Cin,), w1 (3,3,Cin,P), g2,b2 (P,), w2 (3,3,P,P),
    optionally ws (Cin,P) for the 1x1 shortcut conv."""
    assert stride == 1, "TODO(synk): strided variant not implemented in-kernel"
    x = jnp.transpose(x_nchw, (0, 2, 3, 1)).astype(jnp.float32)   # NCHW -> NHWC
    N, H, W, Cin = x.shape
    Cmid = params["w1"].shape[-1]
    Cout = params["w2"].shape[-1]
    has_shortcut = (stride != 1) or (Cin != Cout)

    # Pad channels to lane-dense multiples of 128 (padded channels are exact zeros
    # end-to-end: zero gamma/beta/weights keep them zero through BN/ReLU/conv).
    Cpi, Cpm, Cpo = _rup(Cin, LANE), _rup(Cmid, LANE), _rup(Cout, LANE)
    xp = jnp.pad(x, ((0, 0), (0, 0), (0, 0), (0, Cpi - Cin)))

    vmem_limit = _vmem_limit_bytes()
    BT = _pick_b_tile(N, H, W, Cpi, Cpm, Cpo, vmem_limit)
    nsteps = N // BT
    count = float(N * H * W)

    def pad_vec(v, Cp):
        return jnp.pad(v.astype(jnp.float32), (0, Cp - v.shape[0])).reshape(1, Cp)

    g1, b1 = pad_vec(params["g1"], Cpi), pad_vec(params["b1"], Cpi)
    g2, b2 = pad_vec(params["g2"], Cpm), pad_vec(params["b2"], Cpm)
    w1 = jnp.pad(params["w1"].astype(jnp.float32),
                 ((0, 0), (0, 0), (0, Cpi - Cin), (0, Cpm - Cmid))
                 ).reshape(9 * Cpi, Cpm).astype(jnp.bfloat16)
    w2 = jnp.pad(params["w2"].astype(jnp.float32),
                 ((0, 0), (0, 0), (0, Cpm - Cmid), (0, Cpo - Cout))
                 ).reshape(9 * Cpm, Cpo).astype(jnp.bfloat16)

    cparams = pltpu.CompilerParams(dimension_semantics=("parallel",),
                                   vmem_limit_bytes=vmem_limit)
    vec_spec = lambda C: pl.BlockSpec((1, C), lambda b: (0, 0))
    img_spec = lambda C: pl.BlockSpec((BT, H, W, C), lambda b: (b, 0, 0, 0))
    stat_spec = lambda C: pl.BlockSpec((1, 1, C), lambda b: (b, 0, 0))

    # ---------------- Pass A: BN1 partial sums (parallel) ----------------
    s1, q1 = pl.pallas_call(
        _bn_stats_kernel,
        grid=(nsteps,),
        in_specs=[img_spec(Cpi)],
        out_specs=[stat_spec(Cpi)] * 2,
        out_shape=[jax.ShapeDtypeStruct((nsteps, 1, Cpi), jnp.float32)] * 2,
        compiler_params=cparams,
    )(xp)
    mean1 = jnp.sum(s1, axis=0) / count
    var1 = jnp.maximum(jnp.sum(q1, axis=0) / count - mean1 * mean1, 0.0)

    # -------- Pass B: conv1 + shortcut + BN2 partial sums (parallel) --------
    in_specs = [img_spec(Cpi), vec_spec(Cpi), vec_spec(Cpi), vec_spec(Cpi),
                vec_spec(Cpi), pl.BlockSpec((9 * Cpi, Cpm), lambda b: (0, 0))]
    inputs = [xp, mean1, var1, g1, b1, w1]
    out_specs = [img_spec(Cpm), stat_spec(Cpm), stat_spec(Cpm)]
    out_shape = [jax.ShapeDtypeStruct((N, H, W, Cpm), jnp.bfloat16),
                 jax.ShapeDtypeStruct((nsteps, 1, Cpm), jnp.float32),
                 jax.ShapeDtypeStruct((nsteps, 1, Cpm), jnp.float32)]
    if has_shortcut:
        ws = jnp.pad(params["ws"].astype(jnp.float32),
                     ((0, Cpi - Cin), (0, Cpo - Cout))).astype(jnp.bfloat16)
        in_specs.append(pl.BlockSpec((Cpi, Cpo), lambda b: (0, 0)))
        inputs.append(ws)
        out_specs.append(img_spec(Cpo))
        out_shape.append(jax.ShapeDtypeStruct((N, H, W, Cpo), jnp.bfloat16))

    res = pl.pallas_call(
        functools.partial(_conv1_kernel, BT=BT, H=H, W=W, has_shortcut=has_shortcut),
        grid=(nsteps,),
        in_specs=in_specs,
        out_specs=out_specs,
        out_shape=out_shape,
        scratch_shapes=[pltpu.VMEM((BT, H + 2, W + 2, Cpi), jnp.bfloat16)],
        compiler_params=cparams,
    )(*inputs)
    if has_shortcut:
        h1, s2, q2, shortcut = res
    else:
        h1, s2, q2 = res
        shortcut = xp                          # identity shortcut (Cpi == Cpo), f32
    mean2 = jnp.sum(s2, axis=0) / count
    var2 = jnp.maximum(jnp.sum(q2, axis=0) / count - mean2 * mean2, 0.0)

    # ---------------- Pass C: conv2 + residual add (parallel) ----------------
    out_p = pl.pallas_call(
        functools.partial(_conv2_kernel, BT=BT, H=H, W=W),
        grid=(nsteps,),
        in_specs=[img_spec(Cpm), vec_spec(Cpm), vec_spec(Cpm), vec_spec(Cpm),
                  vec_spec(Cpm), pl.BlockSpec((9 * Cpm, Cpo), lambda b: (0, 0)),
                  img_spec(Cpo)],
        out_specs=img_spec(Cpo),
        out_shape=jax.ShapeDtypeStruct((N, H, W, Cpo), jnp.float32),
        scratch_shapes=[pltpu.VMEM((BT, H + 2, W + 2, Cpm), jnp.bfloat16)],
        compiler_params=cparams,
    )(h1, mean2, var2, g2, b2, w2, shortcut)

    out = out_p[..., :Cout]
    return jnp.transpose(out, (0, 3, 1, 2))            # NHWC -> NCHW


# ---------------------- pure-JAX reference (for sanity check) ----------------------
def _reference(x_nchw, params, has_shortcut):
    def bn_relu(t, g, b):
        m = t.mean(axis=(0, 2, 3), keepdims=True)
        v = ((t - m) ** 2).mean(axis=(0, 2, 3), keepdims=True)
        y = (t - m) * jax.lax.rsqrt(v + EPS) * g.reshape(1, -1, 1, 1) + b.reshape(1, -1, 1, 1)
        return jax.nn.relu(y)

    def conv(t, w_hwio, pad):
        return jax.lax.conv_general_dilated(
            t, w_hwio, (1, 1), [(pad, pad), (pad, pad)],
            dimension_numbers=("NCHW", "HWIO", "NCHW"))

    a = bn_relu(x_nchw, params["g1"], params["b1"])
    if has_shortcut:
        sc = conv(a, params["ws"].reshape(1, 1, *params["ws"].shape), 0)
    else:
        sc = x_nchw
    out = conv(a, params["w1"], 1)
    out = conv(bn_relu(out, params["g2"], params["b2"]), params["w2"], 1)
    return out + sc


if __name__ == "__main__":
    key = jax.random.PRNGKey(0)
    ks = jax.random.split(key, 9)

    # ---- case 1: in_planes != planes -> 1x1 conv shortcut path ----
    N, in_planes, planes, HW = 2, 4, 8, 16
    params = {
        "g1": 1.0 + 0.1 * jax.random.normal(ks[0], (in_planes,), jnp.float32),
        "b1": 0.1 * jax.random.normal(ks[1], (in_planes,), jnp.float32),
        "w1": jax.random.normal(ks[2], (3, 3, in_planes, planes), jnp.float32)
              * (2.0 / (9 * in_planes)) ** 0.5,
        "g2": 1.0 + 0.1 * jax.random.normal(ks[3], (planes,), jnp.float32),
        "b2": 0.1 * jax.random.normal(ks[4], (planes,), jnp.float32),
        "w2": jax.random.normal(ks[5], (3, 3, planes, planes), jnp.float32)
              * (2.0 / (9 * planes)) ** 0.5,
        "ws": jax.random.normal(ks[6], (in_planes, planes), jnp.float32)
              * (2.0 / in_planes) ** 0.5,
    }
    x = jax.random.normal(ks[7], (N, in_planes, HW, HW), jnp.float32)   # NCHW

    out = jax.block_until_ready(preact_block(x, params, stride=1))
    ref = jax.block_until_ready(_reference(x, params, has_shortcut=True))
    assert out.shape == (N, planes, HW, HW), out.shape
    # tolerance accounts for bf16 MXU operands / bf16 h1 + shortcut intermediates
    assert jnp.allclose(out, ref, atol=3e-2, rtol=3e-2), \
        float(jnp.max(jnp.abs(out - ref)))

    # ---- case 2: in_planes == planes -> identity shortcut path ----
    params_id = {
        "g1": 1.0 + 0.1 * jax.random.normal(ks[0], (planes,), jnp.float32),
        "b1": 0.1 * jax.random.normal(ks[1], (planes,), jnp.float32),
        "w1": jax.random.normal(ks[2], (3, 3, planes, planes), jnp.float32)
              * (2.0 / (9 * planes)) ** 0.5,
        "g2": 1.0 + 0.1 * jax.random.normal(ks[3], (planes,), jnp.float32),
        "b2": 0.1 * jax.random.normal(ks[4], (planes,), jnp.float32),
        "w2": jax.random.normal(ks[5], (3, 3, planes, planes), jnp.float32)
              * (2.0 / (9 * planes)) ** 0.5,
    }
    x2 = jax.random.normal(ks[8], (N, planes, HW, HW), jnp.float32)
    out2 = jax.block_until_ready(preact_block(x2, params_id, stride=1))
    ref2 = jax.block_until_ready(_reference(x2, params_id, has_shortcut=False))
    assert out2.shape == (N, planes, HW, HW), out2.shape
    assert jnp.allclose(out2, ref2, atol=3e-2, rtol=3e-2), \
        float(jnp.max(jnp.abs(out2 - ref2)))

    print("KERNEL_OK")
</pallas_src>

<mosaic_0001>
module attributes {stable_mosaic.version = 11 : i64} {
  func.func @_bn_stats_kernel(%arg0: i32, %arg1: memref<2x16x16x128xf32, #tpu.memory_space<vmem>>, %arg2: memref<1x1x128xf32, #tpu.memory_space<vmem>>, %arg3: memref<1x1x128xf32, #tpu.memory_space<vmem>>) attributes {dimension_semantics = [#tpu.dimension_semantics<parallel>], iteration_bounds = array<i64: 1>, scalar_prefetch = 0 : i64, scratch_operands = 0 : i64, tpu.core_type = #tpu.core_type<tc>, window_params = [{transform_indices = @transform_0, window_bounds = array<i64: 2, 16, 16, 128>}, {transform_indices = @transform_1, window_bounds = array<i64: 1, 1, 128>}, {transform_indices = @transform_2, window_bounds = array<i64: 1, 1, 128>}]} {
    %c0 = arith.constant 0 : index
    %c0_0 = arith.constant 0 : index
    %c0_1 = arith.constant 0 : index
    %c0_2 = arith.constant 0 : index
    %0 = vector.load %arg1[%c0, %c0_0, %c0_1, %c0_2] : memref<2x16x16x128xf32, #tpu.memory_space<vmem>>, vector<2x16x16x128xf32>
    %1 = vector.shape_cast %0 : vector<2x16x16x128xf32> to vector<512x128xf32>
    %cst = arith.constant dense<0.000000e+00> : vector<128xf32>
    %2 = vector.multi_reduction <add>, %1, %cst [0] : vector<512x128xf32> to vector<128xf32>
    %3 = vector.shape_cast %2 : vector<128xf32> to vector<1x128xf32>
    %c0_3 = arith.constant 0 : index
    %c0_4 = arith.constant 0 : index
    %c0_5 = arith.constant 0 : index
    %4 = vector.load %arg2[%c0_3, %c0_4, %c0_5] : memref<1x1x128xf32, #tpu.memory_space<vmem>>, vector<1x1x128xf32>
    %5 = vector.shape_cast %4 : vector<1x1x128xf32> to vector<1x128xf32>
    %6 = vector.shape_cast %3 : vector<1x128xf32> to vector<1x1x128xf32>
    tpu.vector_store %arg2[%c0_3, %c0_4, %c0_5], %6 {strides = array<i32>} : memref<1x1x128xf32, #tpu.memory_space<vmem>>, vector<1x1x128xf32>,
    %7 = arith.mulf %1, %1 : vector<512x128xf32>
    %cst_6 = arith.constant dense<0.000000e+00> : vector<128xf32>
    %8 = vector.multi_reduction <add>, %7, %cst_6 [0] : vector<512x128xf32> to vector<128xf32>
    %9 = vector.shape_cast %8 : vector<128xf32> to vector<1x128xf32>
    %c0_7 = arith.constant 0 : index
    %c0_8 = arith.constant 0 : index
    %c0_9 = arith.constant 0 : index
    %10 = vector.load %arg3[%c0_7, %c0_8, %c0_9] : memref<1x1x128xf32, #tpu.memory_space<vmem>>, vector<1x1x128xf32>
    %11 = vector.shape_cast %10 : vector<1x1x128xf32> to vector<1x128xf32>
    %12 = vector.shape_cast %9 : vector<1x128xf32> to vector<1x1x128xf32>
    tpu.vector_store %arg3[%c0_7, %c0_8, %c0_9], %12 {strides = array<i32>} : memref<1x1x128xf32, #tpu.memory_space<vmem>>, vector<1x1x128xf32>,
    return
  }
  func.func @transform_0(%arg0: i32) -> (i32, i32, i32, i32) {
    %c0_i32 = arith.constant 0 : i32
    %c0_i32_0 = arith.constant 0 : i32
    %c0_i32_1 = arith.constant 0 : i32
    %c0_i32_2 = arith.constant 0 : i32
    return %arg0, %c0_i32, %c0_i32_0, %c0_i32_1 : i32, i32, i32, i32
  }
  func.func @transform_1(%arg0: i32) -> (i32, i32, i32) {
    %c0_i32 = arith.constant 0 : i32
    %c0_i32_0 = arith.constant 0 : i32
    %c0_i32_1 = arith.constant 0 : i32
    return %arg0, %c0_i32, %c0_i32_0 : i32, i32, i32
  }
  func.func @transform_2(%arg0: i32) -> (i32, i32, i32) {
    %c0_i32 = arith.constant 0 : i32
    %c0_i32_0 = arith.constant 0 : i32
    %c0_i32_1 = arith.constant 0 : i32
    return %arg0, %c0_i32, %c0_i32_0 : i32, i32, i32
  }
}

</mosaic_0001>

<bundles_post_ra>
// kernel: tpu_custom_call.1
= control target key start
LH: loop header
LB: loop body
LE: loop exit
PB: predicated region body
PF: predicated region fallthrough
CT: control target
= control target key end

     0   :  { %8 = vsyncpa [#allocation3], 0  ;;  %s464_s0 = inlined_call_operand.hbm [shape: f32[2,16,16,128], index: 0, kind: input, shape index: {}]   ;;  %s465_s1 = inlined_call_operand.hbm [shape: f32[1,1,128], index: 1, kind: output, shape index: {0}]   ;;  %s466_s2 = inlined_call_operand.hbm [shape: f32[1,1,128], index: 2, kind: output, shape index: {1}]  }
   0x1   :  { %9 = vsyncpa [#allocation4], 0 }
   0x2   :  { %10 = vsyncpa [#allocation7], 0  ;;  %s400_s9 = smov [#allocation2]   ;;  %s328_s13 = scalar_lea.hbm %s464_s0, 8192 }
   0x3   :  { %s16_s10 = sshll.u32 %s400_s9, 4  ;;  %p329_p0 = scmp.ne.s32.totalorder %s464_s0, %s328_s13  ;;  %s17_s10 = int_to_ptr.vmem [resolvable:$true] %s16_s10 }
   0x4   :  { %p332_p1 = scmp.lt.u32.totalorder %s328_s13, %s464_s0 }
   0x6   :  { %p334_p2 = pnand %p332_p1, %p329_p0 }
   0x8   :  { %337 = shalt.err (!%p334_p2)
}
   0x9   :  { %s338_s18 = scalar_lea.vmem %s17_s10, 8192  ;;  %p343_p4 = scmp.lt.s32.totalorder %s17_s10, %s17_s10 }
   0xa   :  { %p339_p3 = scmp.ne.s32.totalorder %s17_s10, %s338_s18  ;;  %p344_p5 = scmp.lt.s32.totalorder %s338_s18, %s338_s18 }
   0xc   :  { %p345_p6 = por %p344_p5, %p343_p4 }
   0xe   :  { %p346_p7 = pnand %p345_p6, %p339_p3 }
  0x10   :  { %349 = shalt.err (!%p346_p7)
}
  0x11   :  { %s401_s19 = smov 128   ;;  %s402_s20 = smov 8  }
  0x12   :  { %22 = dma.hbm_to_vmem [thread:$0]  %s464_s0, 8192, %s17_s10, [#allocation3], %s401_s19, %s401_s19, %s402_s20  }
  0x13   :  { %394 = dma.done.wait [#allocation3], 8192  }
  0x14   :  { %395 = vsyncadd [#allocation3], 4294959104  ;;  %v26_v0 = vld [vmem:[#allocation2] sm:$0xff]  ;;  %v27_v1 = vld [vmem:[#allocation2 + $0x8] sm:$0xff]  ;;  %s403_s0 = smov [#allocation5]   ;;  %s404_s24 = smov [#allocation6]  }
  0x15   :  { %v28_v2 = vld [vmem:[#allocation2 + $0x10] sm:$0xff]  ;;  %v29_v3 = vld [vmem:[#allocation2 + $0x18] sm:$0xff]  ;;  %v90_v4 = vadd.f32 %v27_v1, %v26_v0  ;;  %v160_v5 = vmul.f32 %v26_v0, %v26_v0  ;;  %v161_v6 = vmul.f32 %v27_v1, %v27_v1  ;;  %v30_v8 = vld [vmem:[#allocation2 + $0x20] sm:$0xff]  ;;  %s300_s23 = sshll.u32 %s403_s0, 4  ;;  %s310_s25 = sshll.u32 %s404_s24, 4  ;;  %s301_s23 = int_to_ptr.vmem [resolvable:$true] %s300_s23  ;;  %s432_s25 = int_to_ptr.vmem [resolvable:$true] %s310_s25 }
  0x16   :  { %v162_v7 = vmul.f32 %v28_v2, %v28_v2  ;;  %v163_v10 = vmul.f32 %v29_v3, %v29_v3  ;;  %v31_v12 = vld [vmem:[#allocation2 + $0x28] sm:$0xff]  ;;  %v164_v14 = vmul.f32 %v30_v8, %v30_v8  ;;  %v32_v16 = vld [vmem:[#allocation2 + $0x30] sm:$0xff]  ;;  %v33_v20 = vld [vmem:[#allocation2 + $0x38] sm:$0xff]  ;;  %s350_s26 = scalar_lea.vmem %s301_s23, 16  ;;  %s354_s27 = scalar_lea.vmem %s301_s23, 32 }
  0x17   :  { %v91_v9 = vadd.f32 %v90_v4, %v28_v2  ;;  %v224_v11 = vadd.f32 %v161_v6, %v160_v5  ;;  %v165_v18 = vmul.f32 %v31_v12, %v31_v12  ;;  %v166_v22 = vmul.f32 %v32_v16, %v32_v16  ;;  %v34_v24 = vld [vmem:[#allocation2 + $0x40] sm:$0xff]  ;;  %v35_v28 = vld [vmem:[#allocation2 + $0x48] sm:$0xff]  ;;  %v36_v32 = vld [vmem:[#allocation2 + $0x50] sm:$0xff]  ;;  %p351_p8 = scmp.ne.s32.totalorder %s301_s23, %s350_s26  ;;  %p355_p9 = scmp.lt.s32.totalorder %s301_s23, %s301_s23 }
  0x18   :  { %v167_v26 = vmul.f32 %v33_v20, %v33_v20  ;;  %v168_v30 = vmul.f32 %v34_v24, %v34_v24  ;;  %v169_v34 = vmul.f32 %v35_v28, %v35_v28  ;;  %v37_v36 = vld [vmem:[#allocation2 + $0x58] sm:$0xff]  ;;  %v170_v38 = vmul.f32 %v36_v32, %v36_v32  ;;  %v38_v40 = vld [vmem:[#allocation2 + $0x60] sm:$0xff]  ;;  %v39_v44 = vld [vmem:[#allocation2 + $0x68] sm:$0xff]  ;;  %p356_p10 = scmp.lt.s32.totalorder %s354_s27, %s350_s26 }
  0x19   :  { %v92_v13 = vadd.f32 %v91_v9, %v29_v3  ;;  %v225_v15 = vadd.f32 %v224_v11, %v162_v7  ;;  %v171_v42 = vmul.f32 %v37_v36, %v37_v36  ;;  %v172_v46 = vmul.f32 %v38_v40, %v38_v40  ;;  %v40_v48 = vld [vmem:[#allocation2 + $0x70] sm:$0xff]  ;;  %v41_v52 = vld [vmem:[#allocation2 + $0x78] sm:$0xff]  ;;  %v42_v56 = vld [vmem:[#allocation2 + $0x80] sm:$0xff] }
  0x1a   :  { %v173_v50 = vmul.f32 %v39_v44, %v39_v44  ;;  %v174_v54 = vmul.f32 %v40_v48, %v40_v48  ;;  %v175_v58 = vmul.f32 %v41_v52, %v41_v52  ;;  %v43_v60 = vld [vmem:[#allocation2 + $0x88] sm:$0xff]  ;;  %v176_v62 = vmul.f32 %v42_v56, %v42_v56  ;;  %v44_v0 = vld [vmem:[#allocation2 + $0x90] sm:$0xff]  ;;  %v45_v4 = vld [vmem:[#allocation2 + $0x98] sm:$0xff]  ;;  %p357_p11 = por %p356_p10, %p355_p9 }
  0x1b   :  { %v93_v17 = vadd.f32 %v92_v13, %v30_v8  ;;  %v226_v19 = vadd.f32 %v225_v15, %v163_v10  ;;  %v177_v2 = vmul.f32 %v43_v60, %v43_v60  ;;  %v178_v6 = vmul.f32 %v44_v0, %v44_v0  ;;  %v46_v8 = vld [vmem:[#allocation2 + $0xa0] sm:$0xff] }
  0x1c   :  { %v179_v10 = vmul.f32 %v45_v4, %v45_v4  ;;  %p358_p12 = pnand %p357_p11, %p351_p8 }
  0x1d   :  { %v94_v21 = vadd.f32 %v93_v17, %v31_v12  ;;  %v227_v23 = vadd.f32 %v226_v19, %v164_v14  ;;  %v47_v12 = vld [vmem:[#allocation2 + $0xa8] sm:$0xff]  ;;  %v180_v14 = vmul.f32 %v46_v8, %v46_v8 }
  0x1f   :  { %v95_v25 = vadd.f32 %v94_v21, %v32_v16  ;;  %v228_v27 = vadd.f32 %v227_v23, %v165_v18  ;;  %v48_v16 = vld [vmem:[#allocation2 + $0xb0] sm:$0xff]  ;;  %v181_v18 = vmul.f32 %v47_v12, %v47_v12 }
  0x21   :  { %v96_v29 = vadd.f32 %v95_v25, %v33_v20  ;;  %v229_v31 = vadd.f32 %v228_v27, %v166_v22  ;;  %v49_v20 = vld [vmem:[#allocation2 + $0xb8] sm:$0xff]  ;;  %v182_v22 = vmul.f32 %v48_v16, %v48_v16 }
  0x23   :  { %v97_v33 = vadd.f32 %v96_v29, %v34_v24  ;;  %v230_v35 = vadd.f32 %v229_v31, %v167_v26  ;;  %v50_v24 = vld [vmem:[#allocation2 + $0xc0] sm:$0xff]  ;;  %v183_v26 = vmul.f32 %v49_v20, %v49_v20 }
  0x25   :  { %v98_v37 = vadd.f32 %v97_v33, %v35_v28  ;;  %v231_v39 = vadd.f32 %v230_v35, %v168_v30  ;;  %v51_v28 = vld [vmem:[#allocation2 + $0xc8] sm:$0xff]  ;;  %v184_v30 = vmul.f32 %v50_v24, %v50_v24 }
  0x27   :  { %v99_v41 = vadd.f32 %v98_v37, %v36_v32  ;;  %v232_v43 = vadd.f32 %v231_v39, %v169_v34  ;;  %v52_v32 = vld [vmem:[#allocation2 + $0xd0] sm:$0xff]  ;;  %v185_v34 = vmul.f32 %v51_v28, %v51_v28 }
  0x29   :  { %v100_v45 = vadd.f32 %v99_v41, %v37_v36  ;;  %v233_v47 = vadd.f32 %v232_v43, %v170_v38  ;;  %v53_v36 = vld [vmem:[#allocation2 + $0xd8] sm:$0xff]  ;;  %v186_v38 = vmul.f32 %v52_v32, %v52_v32 }
  0x2b   :  { %v101_v49 = vadd.f32 %v100_v45, %v38_v40  ;;  %v234_v51 = vadd.f32 %v233_v47, %v171_v42  ;;  %v54_v40 = vld [vmem:[#allocation2 + $0xe0] sm:$0xff]  ;;  %v187_v42 = vmul.f32 %v53_v36, %v53_v36 }
  0x2d   :  { %v102_v53 = vadd.f32 %v101_v49, %v39_v44  ;;  %v235_v55 = vadd.f32 %v234_v51, %v172_v46  ;;  %v55_v44 = vld [vmem:[#allocation2 + $0xe8] sm:$0xff]  ;;  %v188_v46 = vmul.f32 %v54_v40, %v54_v40 }
  0x2f   :  { %v103_v57 = vadd.f32 %v102_v53, %v40_v48  ;;  %v236_v59 = vadd.f32 %v235_v55, %v173_v50  ;;  %v56_v48 = vld [vmem:[#allocation2 + $0xf0] sm:$0xff]  ;;  %v189_v50 = vmul.f32 %v55_v44, %v55_v44 }
  0x31   :  { %v104_v61 = vadd.f32 %v103_v57, %v41_v52  ;;  %v237_v63 = vadd.f32 %v236_v59, %v174_v54  ;;  %v57_v52 = vld [vmem:[#allocation2 + $0xf8] sm:$0xff]  ;;  %v190_v54 = vmul.f32 %v56_v48, %v56_v48 }
  0x33   :  { %v105_v1 = vadd.f32 %v104_v61, %v42_v56  ;;  %v238_v3 = vadd.f32 %v237_v63, %v175_v58  ;;  %v58_v56 = vld [vmem:[#allocation2 + $0x100] sm:$0xff]  ;;  %v191_v58 = vmul.f32 %v57_v52, %v57_v52 }
  0x35   :  { %v106_v5 = vadd.f32 %v105_v1, %v43_v60  ;;  %v239_v7 = vadd.f32 %v238_v3, %v176_v62  ;;  %v59_v60 = vld [vmem:[#allocation2 + $0x108] sm:$0xff]  ;;  %v192_v62 = vmul.f32 %v58_v56, %v58_v56 }
  0x37   :  { %v107_v9 = vadd.f32 %v106_v5, %v44_v0  ;;  %v240_v11 = vadd.f32 %v239_v7, %v177_v2  ;;  %v60_v0 = vld [vmem:[#allocation2 + $0x110] sm:$0xff]  ;;  %v193_v2 = vmul.f32 %v59_v60, %v59_v60 }
  0x39   :  { %v108_v13 = vadd.f32 %v107_v9, %v45_v4  ;;  %v241_v15 = vadd.f32 %v240_v11, %v178_v6  ;;  %v61_v4 = vld [vmem:[#allocation2 + $0x118] sm:$0xff]  ;;  %v194_v6 = vmul.f32 %v60_v0, %v60_v0 }
  0x3b   :  { %v109_v17 = vadd.f32 %v108_v13, %v46_v8  ;;  %v242_v19 = vadd.f32 %v241_v15, %v179_v10  ;;  %v62_v8 = vld [vmem:[#allocation2 + $0x120] sm:$0xff]  ;;  %v195_v10 = vmul.f32 %v61_v4, %v61_v4 }
  0x3d   :  { %v110_v21 = vadd.f32 %v109_v17, %v47_v12  ;;  %v243_v23 = vadd.f32 %v242_v19, %v180_v14  ;;  %v63_v12 = vld [vmem:[#allocation2 + $0x128] sm:$0xff]  ;;  %v196_v14 = vmul.f32 %v62_v8, %v62_v8 }
  0x3f   :  { %v111_v25 = vadd.f32 %v110_v21, %v48_v16  ;;  %v244_v27 = vadd.f32 %v243_v23, %v181_v18  ;;  %v64_v16 = vld [vmem:[#allocation2 + $0x130] sm:$0xff]  ;;  %v197_v18 = vmul.f32 %v63_v12, %v63_v12 }
  0x41   :  { %v112_v29 = vadd.f32 %v111_v25, %v49_v20  ;;  %v245_v31 = vadd.f32 %v244_v27, %v182_v22  ;;  %v65_v20 = vld [vmem:[#allocation2 + $0x138] sm:$0xff]  ;;  %v198_v22 = vmul.f32 %v64_v16, %v64_v16 }
  0x43   :  { %v113_v33 = vadd.f32 %v112_v29, %v50_v24  ;;  %v246_v35 = vadd.f32 %v245_v31, %v183_v26  ;;  %v66_v24 = vld [vmem:[#allocation2 + $0x140] sm:$0xff]  ;;  %v199_v26 = vmul.f32 %v65_v20, %v65_v20 }
  0x45   :  { %v114_v37 = vadd.f32 %v113_v33, %v51_v28  ;;  %v247_v39 = vadd.f32 %v246_v35, %v184_v30  ;;  %v67_v28 = vld [vmem:[#allocation2 + $0x148] sm:$0xff]  ;;  %v200_v30 = vmul.f32 %v66_v24, %v66_v24 }
  0x47   :  { %v115_v41 = vadd.f32 %v114_v37, %v52_v32  ;;  %v248_v43 = vadd.f32 %v247_v39, %v185_v34  ;;  %v68_v32 = vld [vmem:[#allocation2 + $0x150] sm:$0xff]  ;;  %v201_v34 = vmul.f32 %v67_v28, %v67_v28 }
  0x49   :  { %v116_v45 = vadd.f32 %v115_v41, %v53_v36  ;;  %v249_v47 = vadd.f32 %v248_v43, %v186_v38  ;;  %v69_v36 = vld [vmem:[#allocation2 + $0x158] sm:$0xff]  ;;  %v202_v38 = vmul.f32 %v68_v32, %v68_v32 }
  0x4b   :  { %v117_v49 = vadd.f32 %v116_v45, %v54_v40  ;;  %v250_v51 = vadd.f32 %v249_v47, %v187_v42  ;;  %v70_v40 = vld [vmem:[#allocation2 + $0x160] sm:$0xff]  ;;  %v203_v42 = vmul.f32 %v69_v36, %v69_v36 }
  0x4d   :  { %v118_v53 = vadd.f32 %v117_v49, %v55_v44  ;;  %v251_v55 = vadd.f32 %v250_v51, %v188_v46  ;;  %v71_v44 = vld [vmem:[#allocation2 + $0x168] sm:$0xff]  ;;  %v204_v46 = vmul.f32 %v70_v40, %v70_v40 }
  0x4f   :  { %v119_v57 = vadd.f32 %v118_v53, %v56_v48  ;;  %v252_v59 = vadd.f32 %v251_v55, %v189_v50  ;;  %v72_v48 = vld [vmem:[#allocation2 + $0x170] sm:$0xff]  ;;  %v205_v50 = vmul.f32 %v71_v44, %v71_v44 }
  0x51   :  { %v120_v61 = vadd.f32 %v119_v57, %v57_v52  ;;  %v253_v63 = vadd.f32 %v252_v59, %v190_v54  ;;  %v73_v52 = vld [vmem:[#allocation2 + $0x178] sm:$0xff]  ;;  %v206_v54 = vmul.f32 %v72_v48, %v72_v48 }
  0x53   :  { %v121_v1 = vadd.f32 %v120_v61, %v58_v56  ;;  %v254_v3 = vadd.f32 %v253_v63, %v191_v58  ;;  %v74_v56 = vld [vmem:[#allocation2 + $0x180] sm:$0xff]  ;;  %v207_v58 = vmul.f32 %v73_v52, %v73_v52 }
  0x55   :  { %v122_v5 = vadd.f32 %v121_v1, %v59_v60  ;;  %v255_v7 = vadd.f32 %v254_v3, %v192_v62  ;;  %v75_v60 = vld [vmem:[#allocation2 + $0x188] sm:$0xff]  ;;  %v208_v62 = vmul.f32 %v74_v56, %v74_v56 }
  0x57   :  { %v123_v9 = vadd.f32 %v122_v5, %v60_v0  ;;  %v256_v11 = vadd.f32 %v255_v7, %v193_v2  ;;  %v76_v0 = vld [vmem:[#allocation2 + $0x190] sm:$0xff]  ;;  %v209_v2 = vmul.f32 %v75_v60, %v75_v60 }
  0x59   :  { %v124_v13 = vadd.f32 %v123_v9, %v61_v4  ;;  %v257_v15 = vadd.f32 %v256_v11, %v194_v6  ;;  %v77_v4 = vld [vmem:[#allocation2 + $0x198] sm:$0xff]  ;;  %v210_v6 = vmul.f32 %v76_v0, %v76_v0 }
  0x5b   :  { %v125_v17 = vadd.f32 %v124_v13, %v62_v8  ;;  %v258_v19 = vadd.f32 %v257_v15, %v195_v10  ;;  %v78_v8 = vld [vmem:[#allocation2 + $0x1a0] sm:$0xff]  ;;  %v211_v10 = vmul.f32 %v77_v4, %v77_v4 }
  0x5d   :  { %v126_v21 = vadd.f32 %v125_v17, %v63_v12  ;;  %v259_v23 = vadd.f32 %v258_v19, %v196_v14  ;;  %v79_v12 = vld [vmem:[#allocation2 + $0x1a8] sm:$0xff]  ;;  %v212_v14 = vmul.f32 %v78_v8, %v78_v8 }
  0x5f   :  { %v127_v25 = vadd.f32 %v126_v21, %v64_v16  ;;  %v260_v27 = vadd.f32 %v259_v23, %v197_v18  ;;  %v80_v16 = vld [vmem:[#allocation2 + $0x1b0] sm:$0xff]  ;;  %v213_v18 = vmul.f32 %v79_v12, %v79_v12 }
  0x61   :  { %v128_v29 = vadd.f32 %v127_v25, %v65_v20  ;;  %v261_v31 = vadd.f32 %v260_v27, %v198_v22  ;;  %v81_v20 = vld [vmem:[#allocation2 + $0x1b8] sm:$0xff]  ;;  %v214_v22 = vmul.f32 %v80_v16, %v80_v16 }
  0x63   :  { %v129_v33 = vadd.f32 %v128_v29, %v66_v24  ;;  %v262_v35 = vadd.f32 %v261_v31, %v199_v26  ;;  %v82_v24 = vld [vmem:[#allocation2 + $0x1c0] sm:$0xff]  ;;  %v215_v26 = vmul.f32 %v81_v20, %v81_v20 }
  0x65   :  { %v130_v37 = vadd.f32 %v129_v33, %v67_v28  ;;  %v263_v39 = vadd.f32 %v262_v35, %v200_v30  ;;  %v83_v28 = vld [vmem:[#allocation2 + $0x1c8] sm:$0xff]  ;;  %v216_v30 = vmul.f32 %v82_v24, %v82_v24 }
  0x67   :  { %v131_v41 = vadd.f32 %v130_v37, %v68_v32  ;;  %v264_v43 = vadd.f32 %v263_v39, %v201_v34  ;;  %v84_v32 = vld [vmem:[#allocation2 + $0x1d0] sm:$0xff]  ;;  %v217_v34 = vmul.f32 %v83_v28, %v83_v28 }
  0x69   :  { %v132_v45 = vadd.f32 %v131_v41, %v69_v36  ;;  %v265_v47 = vadd.f32 %v264_v43, %v202_v38  ;;  %v85_v36 = vld [vmem:[#allocation2 + $0x1d8] sm:$0xff]  ;;  %v218_v38 = vmul.f32 %v84_v32, %v84_v32 }
  0x6b   :  { %v133_v49 = vadd.f32 %v132_v45, %v70_v40  ;;  %v266_v51 = vadd.f32 %v265_v47, %v203_v42  ;;  %v86_v40 = vld [vmem:[#allocation2 + $0x1e0] sm:$0xff]  ;;  %v219_v42 = vmul.f32 %v85_v36, %v85_v36 }
  0x6d   :  { %v134_v53 = vadd.f32 %v133_v49, %v71_v44  ;;  %v267_v55 = vadd.f32 %v266_v51, %v204_v46  ;;  %v87_v44 = vld [vmem:[#allocation2 + $0x1e8] sm:$0xff]  ;;  %v220_v46 = vmul.f32 %v86_v40, %v86_v40 }
  0x6f   :  { %v135_v57 = vadd.f32 %v134_v53, %v72_v48  ;;  %v268_v59 = vadd.f32 %v267_v55, %v205_v50  ;;  %v88_v48 = vld [vmem:[#allocation2 + $0x1f0] sm:$0xff]  ;;  %v221_v50 = vmul.f32 %v87_v44, %v87_v44 }
  0x71   :  { %v136_v61 = vadd.f32 %v135_v57, %v73_v52  ;;  %v269_v63 = vadd.f32 %v268_v59, %v206_v54  ;;  %v89_v52 = vld [vmem:[#allocation2 + $0x1f8] sm:$0xff]  ;;  %v222_v54 = vmul.f32 %v88_v48, %v88_v48 }
  0x72   :  { %v223_v57 = vmul.f32 %v89_v52, %v89_v52 }
  0x73   :  { %v137_v1 = vadd.f32 %v136_v61, %v74_v56  ;;  %v270_v3 = vadd.f32 %v269_v63, %v207_v58 }
  0x75   :  { %v138_v5 = vadd.f32 %v137_v1, %v75_v60  ;;  %v271_v7 = vadd.f32 %v270_v3, %v208_v62 }
  0x77   :  { %v139_v9 = vadd.f32 %v138_v5, %v76_v0  ;;  %v272_v11 = vadd.f32 %v271_v7, %v209_v2 }
  0x79   :  { %v140_v13 = vadd.f32 %v139_v9, %v77_v4  ;;  %v273_v15 = vadd.f32 %v272_v11, %v210_v6 }
  0x7b   :  { %v141_v17 = vadd.f32 %v140_v13, %v78_v8  ;;  %v274_v19 = vadd.f32 %v273_v15, %v211_v10 }
  0x7d   :  { %v142_v21 = vadd.f32 %v141_v17, %v79_v12  ;;  %v275_v23 = vadd.f32 %v274_v19, %v212_v14 }
  0x7f   :  { %v143_v25 = vadd.f32 %v142_v21, %v80_v16  ;;  %v276_v27 = vadd.f32 %v275_v23, %v213_v18 }
  0x81   :  { %v144_v29 = vadd.f32 %v143_v25, %v81_v20  ;;  %v277_v31 = vadd.f32 %v276_v27, %v214_v22 }
  0x83   :  { %v145_v33 = vadd.f32 %v144_v29, %v82_v24  ;;  %v278_v35 = vadd.f32 %v277_v31, %v215_v26 }
  0x85   :  { %v146_v37 = vadd.f32 %v145_v33, %v83_v28  ;;  %v279_v39 = vadd.f32 %v278_v35, %v216_v30 }
  0x87   :  { %v147_v41 = vadd.f32 %v146_v37, %v84_v32  ;;  %v280_v43 = vadd.f32 %v279_v39, %v217_v34 }
  0x89   :  { %v148_v45 = vadd.f32 %v147_v41, %v85_v36  ;;  %v281_v47 = vadd.f32 %v280_v43, %v218_v38 }
  0x8b   :  { %v149_v49 = vadd.f32 %v148_v45, %v86_v40  ;;  %v282_v51 = vadd.f32 %v281_v47, %v219_v42 }
  0x8d   :  { %v150_v53 = vadd.f32 %v149_v49, %v87_v44  ;;  %v283_v55 = vadd.f32 %v282_v51, %v220_v46 }
  0x8f   :  { %v151_v56 = vadd.f32 %v150_v53, %v88_v48  ;;  %v284_v58 = vadd.f32 %v283_v55, %v221_v50 }
  0x91   :  { %v152_v59 = vadd.f32 %v151_v56, %v89_v52  ;;  %v285_v60 = vadd.f32 %v284_v58, %v222_v54 }
  0x93   :  { %v153_v61 = vrot.slane %v152_v59, 4  ;;  %v286_v62 = vadd.f32 %v285_v60, %v223_v57 }
  0x95   :  { %v154_v63 = vadd.f32 %v153_v61, %v152_v59  ;;  %v287_v0 = vrot.slane %v286_v62, 4 }
  0x97   :  { %v155_v1 = vrot.slane %v154_v63, 2  ;;  %v288_v2 = vadd.f32 %v287_v0, %v286_v62 }
  0x99   :  { %v156_v3 = vadd.f32 %v155_v1, %v154_v63  ;;  %v289_v4 = vrot.slane %v288_v2, 2 }
  0x9b   :  { %v157_v5 = vrot.slane %v156_v3, 1  ;;  %v290_v6 = vadd.f32 %v289_v4, %v288_v2 }
  0x9d   :  { %v158_v7 = vadd.f32 %v157_v5, %v156_v3  ;;  %v291_v8 = vrot.slane %v290_v6, 1 }
  0x9f   :  { %159 = vst [vmem:[#allocation5] sm:$0x1] %v158_v7  ;;  %v292_v9 = vadd.f32 %v291_v8, %v290_v6 }
  0xa0   :  { %361 = shalt.err (!%p358_p12)
}
  0xa1   :  { %s362_s30 = scalar_lea.hbm %s465_s1, 16 }
  0xa2   :  { %p363_p13 = scmp.ne.s32.totalorder %s465_s1, %s362_s30  ;;  %p366_p0 = scmp.lt.u32.totalorder %s362_s30, %s465_s1 }
  0xa4   :  { %p368_p1 = pnand %p366_p0, %p363_p13 }
  0xa6   :  { %371 = shalt.err (!%p368_p1)
}
  0xa7   :  { %303 = dma.vmem_to_hbm [thread:$0]  %s301_s23, 16, %s465_s1, [#allocation4]   ;;  %293 = vst [vmem:[#allocation6] sm:$0x1] %v292_v9 }
  0xa8   :  { %s372_s9 = scalar_lea.vmem %s432_s25, 16  ;;  %s376_s10 = scalar_lea.vmem %s432_s25, 32 }
  0xa9   :  { %p373_p2 = scmp.ne.s32.totalorder %s432_s25, %s372_s9  ;;  %p377_p3 = scmp.lt.s32.totalorder %s432_s25, %s432_s25 }
  0xaa   :  { %p378_p4 = scmp.lt.s32.totalorder %s376_s10, %s372_s9 }
  0xac   :  { %p379_p5 = por %p378_p4, %p377_p3 }
  0xae   :  { %p380_p6 = pnand %p379_p5, %p373_p2 }
  0xb0   :  { %383 = shalt.err (!%p380_p6)
}
  0xb1   :  { %s384_s13 = scalar_lea.hbm %s466_s2, 16 }
  0xb2   :  { %p385_p7 = scmp.ne.s32.totalorder %s466_s2, %s384_s13  ;;  %p388_p8 = scmp.lt.u32.totalorder %s384_s13, %s466_s2 }
  0xb4   :  { %p390_p9 = pnand %p388_p8, %p385_p7 }
  0xb6   :  { %393 = shalt.err (!%p390_p9)
}
  0xb7   :  { %313 = dma.vmem_to_hbm [thread:$0]  %s432_s25, 16, %s466_s2, [#allocation7]  }
  0xb8   :  { %396 = dma.done.wait [#allocation4], 16  }
  0xb9   :  { %397 = vsyncadd [#allocation4], 4294967280 }
  0xba   :  { %398 = dma.done.wait [#allocation7], 16  }
  0xbb   :  { %399 = vsyncadd [#allocation7], 4294967280 }
  0xbc   :  { %320 = vsyncpa [#allocation3], 1 }
  0xbd   :  { %321 = vsyncpa [#allocation4], 1 }
  0xbe   :  { %322 = vsyncpa [#allocation7], 1 }

</bundles_post_ra>
